<compile_context>
chip_gen: v6e
topology: v6e:2x2x1
jax: 0.10.0
libtpu: 0.0.40
codegen_flags: <defaults>
</compile_context>

<pallas_src>
import jax
import jax.numpy as jnp
from jax import lax
from jax.experimental import pallas as pl
from jax.experimental.pallas import tpu as pltpu


def _im2col_conv3(x_win, w_flat, b_row):
    """k=3, pad=1 conv as ONE fused im2col matmul on the MXU.

    x_win:  (C, Lout + 2)  input window, already zero-padded at both ends
    w_flat: (F, 3 * C)     taps stacked on the contraction axis, index t*C + c
    b_row:  (F, Lout)      bias, pre-broadcast along lanes (hoisted by caller)
    returns (F, Lout) = relu(W @ [x(l-1); x(l); x(l+1)] + b)
    """
    l_out = x_win.shape[1] - 2
    col = jnp.concatenate(
        [x_win[:, 0:l_out], x_win[:, 1:l_out + 1], x_win[:, 2:l_out + 2]],
        axis=0)                                                   # (3C, Lout)
    y = jnp.dot(w_flat, col, preferred_element_type=jnp.float32) + b_row
    return jnp.maximum(y, 0.0)


def residual_block_kernel(x_ref, w1_ref, b1_ref, w2_ref, b2_ref, out_ref):
    # x_ref:   (bn, Cin_pad, L + 4)  batch block, L zero-padded by 2 per side
    # out_ref: (bn, F + Cin, L)
    bn, _, lp4 = x_ref.shape
    L = lp4 - 4
    F = b1_ref.shape[0]
    cin_res = out_ref.shape[1] - F          # unpadded residual channel count

    w1 = w1_ref[...]                        # (F, 3*Cin_pad)
    w2 = w2_ref[...]                        # (F, 3*F)

    # Hoisted loop invariants: bias rows and the conv1 halo mask.  JAX does
    # not CSE broadcast_in_dim, so building these inside the loop would emit
    # one broadcast per sample per conv.
    b1_row = jnp.broadcast_to(b1_ref[...], (F, L + 2))
    b2_row = jnp.broadcast_to(b2_ref[...], (F, L))
    lane = lax.broadcasted_iota(jnp.int32, (F, L + 2), 1)
    halo_ok = (lane >= 1) & (lane <= L)     # valid conv1 output positions

    for n in range(bn):                     # static, unrolled; bn is bounded
        xw = x_ref[n]                       # (Cin_pad, L + 4)

        # conv1 evaluated on L+2 positions (one past each edge) so that conv2's
        # shifted views become static slices of y1_ext.
        y1 = _im2col_conv3(xw, w1, b1_row)                    # (F, L + 2)
        y1 = jnp.where(halo_ok, y1, 0.0)                      # zero the halo

        y2 = _im2col_conv3(y1, w2, b2_row)                    # (F, L)

        # Residual concat along channels == two disjoint sublane-range stores.
        out_ref[n, :F, :] = y2.astype(out_ref.dtype)
        out_ref[n, F:, :] = xw[:cin_res, 2:L + 2].astype(out_ref.dtype)


def _pick_batch_block(n):
    """Whole batch in one step for tiny N; otherwise bound the per-step unroll
    (<= 8 samples) and give the megacore >= 2 parallel grid steps."""
    if n < 4:
        return n
    for bb in (8, 4, 2, 1):
        if bb <= n // 2 and n % bb == 0:
            return bb
    return 1


def residual_block(x_ncw, w1, b1, w2, b2):
    """x_ncw: (N, Cin, L) f32 (PyTorch NCW).  w1: (F, Cin, 3), b1: (F,),
    w2: (F, F, 3), b2: (F,).  Returns (N, F + Cin, L) matching PyTorch."""
    N, Cin, L = x_ncw.shape
    F = w1.shape[0]
    cin_pad = ((Cin + 7) // 8) * 8          # sublane-align the contraction dim

    # One-time wrapper prep (no transposes of x): pad channels to a sublane
    # multiple and pad L by 2 on each side so all shifts are static slices.
    x_pad = jnp.pad(x_ncw.astype(jnp.float32),
                    ((0, 0), (0, cin_pad - Cin), (2, 2)))        # (N, Cp, L+4)

    # (F, C, 3) -> (F, 3, C) -> (F, 3*C): flat index t*C + c matches im2col.
    w1_f = jnp.pad(jnp.transpose(w1, (0, 2, 1)).astype(jnp.float32),
                   ((0, 0), (0, 0), (0, cin_pad - Cin))).reshape(F, 3 * cin_pad)
    w2_f = jnp.transpose(w2, (0, 2, 1)).astype(jnp.float32).reshape(F, 3 * F)
    b1_c = b1.reshape(F, 1).astype(jnp.float32)
    b2_c = b2.reshape(F, 1).astype(jnp.float32)

    batch_block = _pick_batch_block(N)
    grid = (N // batch_block,)

    cout = F + Cin
    return pl.pallas_call(
        residual_block_kernel,
        out_shape=jax.ShapeDtypeStruct((N, cout, L), jnp.float32),
        grid_spec=pltpu.PrefetchScalarGridSpec(
            num_scalar_prefetch=0,
            grid=grid,
            in_specs=[
                pl.BlockSpec((batch_block, cin_pad, L + 4), lambda i: (i, 0, 0)),
                # Constant index maps -> weights/biases fetched once, resident.
                pl.BlockSpec((F, 3 * cin_pad), lambda i: (0, 0)),
                pl.BlockSpec((F, 1), lambda i: (0, 0)),
                pl.BlockSpec((F, 3 * F), lambda i: (0, 0)),
                pl.BlockSpec((F, 1), lambda i: (0, 0)),
            ],
            out_specs=pl.BlockSpec((batch_block, cout, L), lambda i: (i, 0, 0)),
        ),
        compiler_params=pltpu.CompilerParams(
            dimension_semantics=("parallel",)),
    )(x_pad, w1_f, b1_c, w2_f, b2_c)


def _reference(x_ncw, w1, b1, w2, b2):
    """Plain-JAX reference matching torch.nn.functional.conv1d semantics."""
    def conv1d(x, w, b):
        y = lax.conv_general_dilated(
            x, w, window_strides=(1,), padding=((1, 1),),
            dimension_numbers=("NCH", "OIH", "NCH"))
        return y + b[None, :, None]
    out = jax.nn.relu(conv1d(x_ncw, w1, b1))
    out = jax.nn.relu(conv1d(out, w2, b2))
    return jnp.concatenate([out, x_ncw], axis=1)


if __name__ == "__main__":
    # Small shapes consistent with the module: batch=2, input_channels=21,
    # filters=16, sequence length=16.
    N, Cin, F, L = 2, 21, 16, 16

    key = jax.random.PRNGKey(0)
    kx, kw1, kb1, kw2, kb2 = jax.random.split(key, 5)

    x = jax.random.normal(kx, (N, Cin, L), dtype=jnp.float32)

    # Deterministic parameter init (PyTorch-style uniform bounds).
    bound1 = 1.0 / jnp.sqrt(Cin * 3.0)
    w1 = jax.random.uniform(kw1, (F, Cin, 3), minval=-bound1, maxval=bound1,
                            dtype=jnp.float32)
    b1 = jax.random.uniform(kb1, (F,), minval=-bound1, maxval=bound1,
                            dtype=jnp.float32)
    bound2 = 1.0 / jnp.sqrt(F * 3.0)
    w2 = jax.random.uniform(kw2, (F, F, 3), minval=-bound2, maxval=bound2,
                            dtype=jnp.float32)
    b2 = jax.random.uniform(kb2, (F,), minval=-bound2, maxval=bound2,
                            dtype=jnp.float32)

    out = residual_block(x, w1, b1, w2, b2)
    out = jax.block_until_ready(out)

    ref = jax.block_until_ready(_reference(x, w1, b1, w2, b2))
    assert out.shape == (N, F + Cin, L), out.shape
    assert jnp.allclose(out, ref, atol=1e-5, rtol=1e-5), "mismatch vs reference"

    print("KERNEL_OK")
</pallas_src>

<mosaic_0001>
module attributes {stable_mosaic.version = 11 : i64} {
  func.func @residual_block_kernel(%arg0: i32, %arg1: memref<2x24x20xf32, #tpu.memory_space<vmem>>, %arg2: memref<16x72xf32, #tpu.memory_space<vmem>>, %arg3: memref<16x1xf32, #tpu.memory_space<vmem>>, %arg4: memref<16x48xf32, #tpu.memory_space<vmem>>, %arg5: memref<16x1xf32, #tpu.memory_space<vmem>>, %arg6: memref<2x37x16xf32, #tpu.memory_space<vmem>>) attributes {dimension_semantics = [#tpu.dimension_semantics<parallel>], iteration_bounds = array<i64: 1>, scalar_prefetch = 0 : i64, scratch_operands = 0 : i64, tpu.core_type = #tpu.core_type<tc>, window_params = [{transform_indices = @transform_0, window_bounds = array<i64: 2, 24, 20>}, {pipeline_mode = #tpu.pipeline_mode<synchronous>, transform_indices = @transform_1, window_bounds = array<i64: 16, 72>}, {pipeline_mode = #tpu.pipeline_mode<synchronous>, transform_indices = @transform_2, window_bounds = array<i64: 16, 1>}, {pipeline_mode = #tpu.pipeline_mode<synchronous>, transform_indices = @transform_3, window_bounds = array<i64: 16, 48>}, {pipeline_mode = #tpu.pipeline_mode<synchronous>, transform_indices = @transform_4, window_bounds = array<i64: 16, 1>}, {transform_indices = @transform_5, window_bounds = array<i64: 2, 37, 16>}]} {
    %c0 = arith.constant 0 : index
    %c0_0 = arith.constant 0 : index
    %0 = vector.load %arg2[%c0, %c0_0] : memref<16x72xf32, #tpu.memory_space<vmem>>, vector<16x72xf32>
    %c0_1 = arith.constant 0 : index
    %c0_2 = arith.constant 0 : index
    %1 = vector.load %arg4[%c0_1, %c0_2] : memref<16x48xf32, #tpu.memory_space<vmem>>, vector<16x48xf32>
    %c0_3 = arith.constant 0 : index
    %c0_4 = arith.constant 0 : index
    %2 = vector.load %arg3[%c0_3, %c0_4] : memref<16x1xf32, #tpu.memory_space<vmem>>, vector<16x1xf32>
    %3 = vector.shape_cast %2 : vector<16x1xf32> to vector<16x1xf32>
    %4 = vector.broadcast %3 : vector<16x1xf32> to vector<16x18xf32>
    %c0_5 = arith.constant 0 : index
    %c0_6 = arith.constant 0 : index
    %5 = vector.load %arg5[%c0_5, %c0_6] : memref<16x1xf32, #tpu.memory_space<vmem>>, vector<16x1xf32>
    %6 = vector.shape_cast %5 : vector<16x1xf32> to vector<16x1xf32>
    %7 = vector.broadcast %6 : vector<16x1xf32> to vector<16x16xf32>
    %8 = tpu.iota {dimensions = array<i32: 1>} : vector<16x18xi32>
    %c1_i32 = arith.constant 1 : i32
    %9 = vector.broadcast %c1_i32 : i32 to vector<16x18xi32>
    %10 = arith.cmpi sge, %8, %9 : vector<16x18xi32>
    %c16_i32 = arith.constant 16 : i32
    %11 = vector.broadcast %c16_i32 : i32 to vector<16x18xi32>
    %12 = arith.cmpi sle, %8, %11 : vector<16x18xi32>
    %13 = arith.andi %10, %12 : vector<16x18xi1>
    %c0_7 = arith.constant 0 : index
    %c0_8 = arith.constant 0 : index
    %c0_9 = arith.constant 0 : index
    %14 = vector.load %arg1[%c0_7, %c0_8, %c0_9] : memref<2x24x20xf32, #tpu.memory_space<vmem>>, vector<1x24x20xf32>
    %15 = vector.shape_cast %14 : vector<1x24x20xf32> to vector<24x20xf32>
    %16 = vector.extract_strided_slice %15 {offsets = [0, 0], sizes = [24, 18], strides = [1, 1]} : vector<24x20xf32> to vector<24x18xf32>
    %17 = vector.extract_strided_slice %15 {offsets = [0, 1], sizes = [24, 18], strides = [1, 1]} : vector<24x20xf32> to vector<24x18xf32>
    %18 = vector.extract_strided_slice %15 {offsets = [0, 2], sizes = [24, 18], strides = [1, 1]} : vector<24x20xf32> to vector<24x18xf32>
    %19 = tpu.concatenate %16, %17, %18 in 0 : vector<24x18xf32>, vector<24x18xf32>, vector<24x18xf32> -> vector<72x18xf32>
    %cst = arith.constant dense<0.000000e+00> : vector<16x18xf32>
    %20 = tpu.matmul %0, %19, %cst {dimension_numbers = #tpu.dot_dimension_numbers<[1], [0], [0], [1], [0, 0, 1, 1], [], []>} : vector<16x72xf32>, vector<72x18xf32>, vector<16x18xf32> -> vector<16x18xf32>
    %21 = arith.addf %20, %4 : vector<16x18xf32>
    %cst_10 = arith.constant 0.000000e+00 : f32
    %22 = vector.broadcast %cst_10 : f32 to vector<16x18xf32>
    %23 = arith.maximumf %21, %22 : vector<16x18xf32>
    %cst_11 = arith.constant 0.000000e+00 : f32
    %24 = vector.broadcast %cst_11 : f32 to vector<16x18xf32>
    %25 = arith.select %13, %23, %24 : vector<16x18xi1>, vector<16x18xf32>
    %26 = vector.extract_strided_slice %25 {offsets = [0, 0], sizes = [16, 16], strides = [1, 1]} : vector<16x18xf32> to vector<16x16xf32>
    %27 = vector.extract_strided_slice %25 {offsets = [0, 1], sizes = [16, 16], strides = [1, 1]} : vector<16x18xf32> to vector<16x16xf32>
    %28 = vector.extract_strided_slice %25 {offsets = [0, 2], sizes = [16, 16], strides = [1, 1]} : vector<16x18xf32> to vector<16x16xf32>
    %29 = tpu.concatenate %26, %27, %28 in 0 : vector<16x16xf32>, vector<16x16xf32>, vector<16x16xf32> -> vector<48x16xf32>
    %cst_12 = arith.constant dense<0.000000e+00> : vector<16x16xf32>
    %30 = tpu.matmul %1, %29, %cst_12 {dimension_numbers = #tpu.dot_dimension_numbers<[1], [0], [0], [1], [0, 0, 1, 1], [], []>} : vector<16x48xf32>, vector<48x16xf32>, vector<16x16xf32> -> vector<16x16xf32>
    %31 = arith.addf %30, %7 : vector<16x16xf32>
    %cst_13 = arith.constant 0.000000e+00 : f32
    %32 = vector.broadcast %cst_13 : f32 to vector<16x16xf32>
    %33 = arith.maximumf %31, %32 : vector<16x16xf32>
    %c0_14 = arith.constant 0 : index
    %c0_15 = arith.constant 0 : index
    %c0_16 = arith.constant 0 : index
    %34 = vector.load %arg6[%c0_14, %c0_15, %c0_16] : memref<2x37x16xf32, #tpu.memory_space<vmem>>, vector<1x16x16xf32>
    %35 = vector.shape_cast %34 : vector<1x16x16xf32> to vector<16x16xf32>
    %36 = vector.shape_cast %33 : vector<16x16xf32> to vector<1x16x16xf32>
    tpu.vector_store %arg6[%c0_14, %c0_15, %c0_16], %36 {strides = array<i32>} : memref<2x37x16xf32, #tpu.memory_space<vmem>>, vector<1x16x16xf32>,
    %37 = vector.extract_strided_slice %15 {offsets = [0, 2], sizes = [21, 16], strides = [1, 1]} : vector<24x20xf32> to vector<21x16xf32>
    %c0_17 = arith.constant 0 : index
    %c16 = arith.constant 16 : index
    %c0_18 = arith.constant 0 : index
    %38 = vector.load %arg6[%c0_17, %c16, %c0_18] : memref<2x37x16xf32, #tpu.memory_space<vmem>>, vector<1x21x16xf32>
    %39 = vector.shape_cast %38 : vector<1x21x16xf32> to vector<21x16xf32>
    %40 = vector.shape_cast %37 : vector<21x16xf32> to vector<1x21x16xf32>
    tpu.vector_store %arg6[%c0_17, %c16, %c0_18], %40 {strides = array<i32>} : memref<2x37x16xf32, #tpu.memory_space<vmem>>, vector<1x21x16xf32>,
    %c1 = arith.constant 1 : index
    %c0_19 = arith.constant 0 : index
    %c0_20 = arith.constant 0 : index
    %41 = vector.load %arg1[%c1, %c0_19, %c0_20] : memref<2x24x20xf32, #tpu.memory_space<vmem>>, vector<1x24x20xf32>
    %42 = vector.shape_cast %41 : vector<1x24x20xf32> to vector<24x20xf32>
    %43 = vector.extract_strided_slice %42 {offsets = [0, 0], sizes = [24, 18], strides = [1, 1]} : vector<24x20xf32> to vector<24x18xf32>
    %44 = vector.extract_strided_slice %42 {offsets = [0, 1], sizes = [24, 18], strides = [1, 1]} : vector<24x20xf32> to vector<24x18xf32>
    %45 = vector.extract_strided_slice %42 {offsets = [0, 2], sizes = [24, 18], strides = [1, 1]} : vector<24x20xf32> to vector<24x18xf32>
    %46 = tpu.concatenate %43, %44, %45 in 0 : vector<24x18xf32>, vector<24x18xf32>, vector<24x18xf32> -> vector<72x18xf32>
    %cst_21 = arith.constant dense<0.000000e+00> : vector<16x18xf32>
    %47 = tpu.matmul %0, %46, %cst_21 {dimension_numbers = #tpu.dot_dimension_numbers<[1], [0], [0], [1], [0, 0, 1, 1], [], []>} : vector<16x72xf32>, vector<72x18xf32>, vector<16x18xf32> -> vector<16x18xf32>
    %48 = arith.addf %47, %4 : vector<16x18xf32>
    %cst_22 = arith.constant 0.000000e+00 : f32
    %49 = vector.broadcast %cst_22 : f32 to vector<16x18xf32>
    %50 = arith.maximumf %48, %49 : vector<16x18xf32>
    %cst_23 = arith.constant 0.000000e+00 : f32
    %51 = vector.broadcast %cst_23 : f32 to vector<16x18xf32>
    %52 = arith.select %13, %50, %51 : vector<16x18xi1>, vector<16x18xf32>
    %53 = vector.extract_strided_slice %52 {offsets = [0, 0], sizes = [16, 16], strides = [1, 1]} : vector<16x18xf32> to vector<16x16xf32>
    %54 = vector.extract_strided_slice %52 {offsets = [0, 1], sizes = [16, 16], strides = [1, 1]} : vector<16x18xf32> to vector<16x16xf32>
    %55 = vector.extract_strided_slice %52 {offsets = [0, 2], sizes = [16, 16], strides = [1, 1]} : vector<16x18xf32> to vector<16x16xf32>
    %56 = tpu.concatenate %53, %54, %55 in 0 : vector<16x16xf32>, vector<16x16xf32>, vector<16x16xf32> -> vector<48x16xf32>
    %cst_24 = arith.constant dense<0.000000e+00> : vector<16x16xf32>
    %57 = tpu.matmul %1, %56, %cst_24 {dimension_numbers = #tpu.dot_dimension_numbers<[1], [0], [0], [1], [0, 0, 1, 1], [], []>} : vector<16x48xf32>, vector<48x16xf32>, vector<16x16xf32> -> vector<16x16xf32>
    %58 = arith.addf %57, %7 : vector<16x16xf32>
    %cst_25 = arith.constant 0.000000e+00 : f32
    %59 = vector.broadcast %cst_25 : f32 to vector<16x16xf32>
    %60 = arith.maximumf %58, %59 : vector<16x16xf32>
    %c1_26 = arith.constant 1 : index
    %c0_27 = arith.constant 0 : index
    %c0_28 = arith.constant 0 : index
    %61 = vector.load %arg6[%c1_26, %c0_27, %c0_28] : memref<2x37x16xf32, #tpu.memory_space<vmem>>, vector<1x16x16xf32>
    %62 = vector.shape_cast %61 : vector<1x16x16xf32> to vector<16x16xf32>
    %63 = vector.shape_cast %60 : vector<16x16xf32> to vector<1x16x16xf32>
    tpu.vector_store %arg6[%c1_26, %c0_27, %c0_28], %63 {strides = array<i32>} : memref<2x37x16xf32, #tpu.memory_space<vmem>>, vector<1x16x16xf32>,
    %64 = vector.extract_strided_slice %42 {offsets = [0, 2], sizes = [21, 16], strides = [1, 1]} : vector<24x20xf32> to vector<21x16xf32>
    %c1_29 = arith.constant 1 : index
    %c16_30 = arith.constant 16 : index
    %c0_31 = arith.constant 0 : index
    %65 = vector.load %arg6[%c1_29, %c16_30, %c0_31] : memref<2x37x16xf32, #tpu.memory_space<vmem>>, vector<1x21x16xf32>
    %66 = vector.shape_cast %65 : vector<1x21x16xf32> to vector<21x16xf32>
    %67 = vector.shape_cast %64 : vector<21x16xf32> to vector<1x21x16xf32>
    tpu.vector_store %arg6[%c1_29, %c16_30, %c0_31], %67 {strides = array<i32>} : memref<2x37x16xf32, #tpu.memory_space<vmem>>, vector<1x21x16xf32>,
    return
  }
  func.func @transform_0(%arg0: i32) -> (i32, i32, i32) {
    %c0_i32 = arith.constant 0 : i32
    %c0_i32_0 = arith.constant 0 : i32
    %c0_i32_1 = arith.constant 0 : i32
    return %arg0, %c0_i32, %c0_i32_0 : i32, i32, i32
  }
  func.func @transform_1(%arg0: i32) -> (i32, i32) {
    %c0_i32 = arith.constant 0 : i32
    %c0_i32_0 = arith.constant 0 : i32
    %c0_i32_1 = arith.constant 0 : i32
    return %c0_i32, %c0_i32_0 : i32, i32
  }
  func.func @transform_2(%arg0: i32) -> (i32, i32) {
    %c0_i32 = arith.constant 0 : i32
    %c0_i32_0 = arith.constant 0 : i32
    %c0_i32_1 = arith.constant 0 : i32
    return %c0_i32, %c0_i32_0 : i32, i32
  }
  func.func @transform_3(%arg0: i32) -> (i32, i32) {
    %c0_i32 = arith.constant 0 : i32
    %c0_i32_0 = arith.constant 0 : i32
    %c0_i32_1 = arith.constant 0 : i32
    return %c0_i32, %c0_i32_0 : i32, i32
  }
  func.func @transform_4(%arg0: i32) -> (i32, i32) {
    %c0_i32 = arith.constant 0 : i32
    %c0_i32_0 = arith.constant 0 : i32
    %c0_i32_1 = arith.constant 0 : i32
    return %c0_i32, %c0_i32_0 : i32, i32
  }
  func.func @transform_5(%arg0: i32) -> (i32, i32, i32) {
    %c0_i32 = arith.constant 0 : i32
    %c0_i32_0 = arith.constant 0 : i32
    %c0_i32_1 = arith.constant 0 : i32
    return %arg0, %c0_i32, %c0_i32_0 : i32, i32, i32
  }
}

</mosaic_0001>

<bundles_post_ra>
// kernel: tpu_custom_call.1
= control target key start
LH: loop header
LB: loop body
LE: loop exit
PB: predicated region body
PF: predicated region fallthrough
CT: control target
= control target key end

     0   :  { %s608_s22 = smov 126   ;;  %s609_s25 = smov 127   ;;  %vm77_vm0 = vcmask 588800   ;;  %v610_v4 = vmov 0   ;;  %vm266_vm1 = vcmask 126976   ;;  %vm261_vm2 = vcmask 130048   ;;  %s799_s0 = inlined_call_operand.vmem [shape: f32[2,24,20], index: 0, kind: input, shape index: {}]   ;;  %s800_s1 = inlined_call_operand.vmem [shape: f32[16,72], index: 1, kind: input, shape index: {}]   ;;  %s801_s2 = inlined_call_operand.vmem [shape: f32[16,1], index: 2, kind: input, shape index: {}]   ;;  %s802_s5 = inlined_call_operand.vmem [shape: f32[2,37,16], index: 5, kind: output, shape index: {}]   ;;  %s803_s3 = inlined_call_operand.vmem [shape: f32[16,48], index: 3, kind: input, shape index: {}]   ;;  %s804_s4 = inlined_call_operand.vmem [shape: f32[16,1], index: 4, kind: input, shape index: {}]  }
   0x1   :  { %v55_v0 = vld [vmem:[%s799_s0 + $0x10] sm:$0xff]  ;;  %v53_v1 = vld [vmem:[%s799_s0] sm:$0xff]  ;;  %v54_v2 = vld [vmem:[%s799_s0 + $0x8] sm:$0xff]  ;;  %606 = vset.pattern.permute.xlu0 %v610_v4  ;;  %607 = vset.pattern.permute.xlu1 %v610_v4  ;;  %v48_v14 = vlaneseq  ;;  %vm177_vm6 = vcmask 392192  }
   0x2   :  { %72 = vrot.lane.b32.xlu0 %v55_v0, %s608_s22  ;;  %68 = vrot.lane.b32.xlu1 %v53_v1, %s608_s22  ;;  %v657_v3 = vld [vmem:[%s800_s1] sm:$0xff]  ;;  %v25_v5 = vld [vmem:[%s801_s2 + $0x8] sm:$0xff] }
   0x3   :  { %549 = vmatprep.mubr.msk.f32.mxu0 %vm77_vm0, %v657_v3  ;;  %v24_v6 = vld [vmem:[%s801_s2] sm:$0xff]  ;;  %v684_v13 = vld [vmem:[%s800_s1 + $0x8] sm:$0xff]  ;;  %v49_v15 = vand.u32 127, %v48_v14  ;;  %v479_v30 = vld [vmem:[%s799_s0 + $0x18] sm:$0xff] }
   0x4   :  { %v22_v24 = vld [vmem:[%s803_s3] sm:$0xff]  ;;  %v481_v28 = vld [vmem:[%s799_s0 + $0x28] sm:$0xff] }
   0x5   :  { %vm50_vm3 = vcmp.ge.s32.totalorder %v49_v15, 1  ;;  %vm51_vm4 = vcmp.le.s32.totalorder %v49_v15, 16  ;;  %564 = vmatprep.mubr.msk.f32.mxu1 %vm177_vm6, %v22_v24  ;;  %v480_v29 = vld [vmem:[%s799_s0 + $0x20] sm:$0xff]  ;;  %v737_v36 = vld [vmem:[%s803_s3 + $0x8] sm:$0xff] }
   0x6   :  { %70 = vrot.lane.b32.xlu0 %v54_v2, %s608_s22  ;;  %63 = vrot.lane.b32.xlu1 %v55_v0, %s609_s25  ;;  %vm693_vm5 = vmand %vm50_vm3, %vm51_vm4  ;;  %v36_v52 = vld [vmem:[%s804_s4] sm:$0xff]  ;;  %v37_v53 = vld [vmem:[%s804_s4 + $0x8] sm:$0xff] }
   0xa   :  { %61 = vrot.lane.b32.xlu0 %v54_v2, %s609_s25  ;;  %59 = vrot.lane.b32.xlu1 %v53_v1, %s609_s25 }
   0xe   :  { %33 = vperm.xlu0 %606, %v25_v5   ;;  %28 = vperm.xlu1 %607, %v24_v6  }
  0x74   :  { %v73_v7 = vpop.permute.xlu0 %72  ;;  %v69_v8 = vpop.permute.xlu1 %68 }
  0x75   :  { %267 = vst.msk [vmem:[%s802_s5 + $0x20] sm:$0x1f] %vm266_vm1, %v73_v7  ;;  %531 = vmatprep.subr.mxu0 %v73_v7 }
  0x76   :  { %264 = vst.msk [vmem:[%s802_s5 + $0x10] sm:$0xff] %vm261_vm2, %v69_v8  ;;  %532 = vmatpush3.msra.mxu0 %v73_v7 }
  0x78   :  { %v71_v9 = vpop.permute.xlu0 %70  ;;  %v64_v10 = vpop.permute.xlu1 %63 }
  0x79   :  { %265 = vst.msk [vmem:[%s802_s5 + $0x18] sm:$0xff] %vm261_vm2, %v71_v9  ;;  %533 = vmatprep.subr.mxu0 %v71_v9 }
  0x7a   :  { %534 = vmatpush3.msra.mxu0 %v71_v9 }
  0x7b   :  { %535 = vmatprep.subr.mxu0 %v69_v8 }
  0x7c   :  { %536 = vmatpush3.msra.mxu0 %v69_v8  ;;  %v62_v11 = vpop.permute.xlu0 %61  ;;  %v60_v12 = vpop.permute.xlu1 %59 }
  0x7d   :  { %537 = vmatprep.subr.mxu0 %v64_v10 }
  0x7e   :  { %538 = vmatpush3.msra.mxu0 %v64_v10 }
  0x7f   :  { %539 = vmatprep.subr.mxu0 %v62_v11 }
  0x80   :  { %540 = vmatpush3.msra.mxu0 %v62_v11 }
  0x81   :  { %541 = vmatprep.subr.mxu0 %v60_v12 }
  0x82   :  { %542 = vmatpush3.msra.mxu0 %v60_v12 }
  0x83   :  { %543 = vmatprep.subr.mxu0 %v55_v0 }
  0x84   :  { %544 = vmatpush3.msra.mxu0 %v55_v0 }
  0x85   :  { %545 = vmatprep.subr.mxu0 %v54_v2 }
  0x86   :  { %546 = vmatpush3.msra.mxu0 %v54_v2 }
  0x87   :  { %547 = vmatprep.subr.mxu0 %v53_v1 }
  0x88   :  { %548 = vmatpush3.msra.mxu0 %v53_v1 }
  0x89   :  { %550 = vmatmul.mubr.msk.f32.vlgmr.msra.gmra.mxu0 %vm77_vm0, %v684_v13  ;;  %v688_v16 = vpop.permute.xlu0 %33  ;;  %v690_v18 = vpop.permute.xlu1 %28 }
  0x8a   :  { %600 = vmatprep.mubr.msk.f32.mxu0 %vm177_vm6, %v22_v24 }
 0x149   :  { %v551_v17 = vpop.f32.mrf.mxu0 }
 0x14a   :  { %v156_v19 = vadd.f32 %v551_v17, %v688_v16 }
 0x14b   :  { %v150_v20 = vpop.f32.mrf.mxu0 }
 0x14c   :  { %v160_v22 = vmax.f32 %v156_v19, 0.0  ;;  %v151_v23 = vadd.f32 %v150_v20, %v690_v18 }
 0x14e   :  { %v159_v25 = vmax.f32 %v151_v23, 0.0  ;;  %v162_v26 = vsel %vm693_vm5, %v160_v22, 0.0 }
 0x14f   :  { %173 = vrot.lane.b32.xlu1 %v162_v26, %s608_s22 }
 0x150   :  { %v161_v27 = vsel %vm693_vm5, %v159_v25, 0.0 }
 0x151   :  { %171 = vrot.lane.b32.xlu0 %v161_v27, %s608_s22 }
 0x153   :  { %167 = vrot.lane.b32.xlu1 %v162_v26, %s609_s25 }
 0x155   :  { %165 = vrot.lane.b32.xlu0 %v161_v27, %s609_s25 }
 0x157   :  { %288 = vrot.lane.b32.xlu1 %v481_v28, %s608_s22 }
 0x159   :  { %286 = vrot.lane.b32.xlu0 %v480_v29, %s608_s22 }
 0x15b   :  { %284 = vrot.lane.b32.xlu1 %v479_v30, %s608_s22 }
 0x15d   :  { %279 = vrot.lane.b32.xlu0 %v481_v28, %s609_s25 }
 0x15f   :  { %277 = vrot.lane.b32.xlu1 %v480_v29, %s609_s25 }
 0x161   :  { %275 = vrot.lane.b32.xlu0 %v479_v30, %s609_s25 }
 0x1c1   :  { %v174_v31 = vpop.permute.xlu1 %173 }
 0x1c2   :  { %552 = vmatprep.subr.mxu1 %v174_v31 }
 0x1c3   :  { %v172_v32 = vpop.permute.xlu0 %171  ;;  %553 = vmatpush3.msra.mxu1 %v174_v31 }
 0x1c4   :  { %554 = vmatprep.subr.mxu1 %v172_v32 }
 0x1c5   :  { %555 = vmatpush3.msra.mxu1 %v172_v32  ;;  %v168_v33 = vpop.permute.xlu1 %167 }
 0x1c6   :  { %556 = vmatprep.subr.mxu1 %v168_v33 }
 0x1c7   :  { %v166_v34 = vpop.permute.xlu0 %165  ;;  %557 = vmatpush3.msra.mxu1 %v168_v33 }
 0x1c8   :  { %558 = vmatprep.subr.mxu1 %v166_v34 }
 0x1c9   :  { %559 = vmatpush3.msra.mxu1 %v166_v34  ;;  %v289_v35 = vpop.permute.xlu1 %288 }
 0x1ca   :  { %560 = vmatprep.subr.msk.mxu1 %vm693_vm5, %v160_v22  ;;  %492 = vst.msk [vmem:[%s802_s5 + $0x48] sm:$0x1f] %vm266_vm1, %v289_v35 }
 0x1cb   :  { %561 = vmatpush3.msk.msra.mxu1 %vm693_vm5, %v160_v22  ;;  %v287_v37 = vpop.permute.xlu0 %286 }
 0x1cc   :  { %562 = vmatprep.subr.msk.mxu1 %vm693_vm5, %v159_v25  ;;  %491 = vst.msk [vmem:[%s802_s5 + $0x40] sm:$0xff] %vm261_vm2, %v287_v37 }
 0x1cd   :  { %563 = vmatpush3.msk.msra.mxu1 %vm693_vm5, %v159_v25  ;;  %v285_v38 = vpop.permute.xlu1 %284 }
 0x1ce   :  { %565 = vmatmul.mubr.msk.f32.vlgmr.msra.gmra.mxu1 %vm177_vm6, %v737_v36  ;;  %567 = vmatprep.subr.mxu1 %v289_v35  ;;  %490 = vst.msk [vmem:[%s802_s5 + $0x38] sm:$0xff] %vm261_vm2, %v285_v38 }
 0x1cf   :  { %568 = vmatpush3.msra.mxu1 %v289_v35  ;;  %v280_v39 = vpop.permute.xlu0 %279  ;;  %585 = vmatprep.mubr.msk.f32.mxu1 %vm77_vm0, %v657_v3 }
 0x1d0   :  { %569 = vmatprep.subr.mxu1 %v287_v37 }
 0x1d1   :  { %570 = vmatpush3.msra.mxu1 %v287_v37  ;;  %v278_v40 = vpop.permute.xlu1 %277 }
 0x1d2   :  { %571 = vmatprep.subr.mxu1 %v285_v38 }
 0x1d3   :  { %572 = vmatpush3.msra.mxu1 %v285_v38  ;;  %v276_v41 = vpop.permute.xlu0 %275 }
 0x1d4   :  { %573 = vmatprep.subr.mxu1 %v280_v39 }
 0x1d5   :  { %574 = vmatpush3.msra.mxu1 %v280_v39 }
 0x1d6   :  { %575 = vmatprep.subr.mxu1 %v278_v40 }
 0x1d7   :  { %576 = vmatpush3.msra.mxu1 %v278_v40 }
 0x1d8   :  { %577 = vmatprep.subr.mxu1 %v276_v41 }
 0x1d9   :  { %578 = vmatpush3.msra.mxu1 %v276_v41 }
 0x1da   :  { %579 = vmatprep.subr.mxu1 %v481_v28 }
 0x1db   :  { %580 = vmatpush3.msra.mxu1 %v481_v28 }
 0x1dc   :  { %581 = vmatprep.subr.mxu1 %v480_v29 }
 0x1dd   :  { %582 = vmatpush3.msra.mxu1 %v480_v29 }
 0x1de   :  { %583 = vmatprep.subr.mxu1 %v479_v30 }
 0x1df   :  { %584 = vmatpush3.msra.mxu1 %v479_v30 }
 0x1e0   :  { %586 = vmatmul.mubr.msk.f32.vlgmr.msra.gmra.mxu1 %vm77_vm0, %v684_v13 }
 0x28e   :  { %v566_v42 = vpop.f32.mrf.mxu1 }
 0x290   :  { %v250_v43 = vpop.f32.mrf.mxu1 }
 0x2a0   :  { %v587_v44 = vpop.f32.mrf.mxu1 }
 0x2a1   :  { %v365_v45 = vadd.f32 %v587_v44, %v688_v16 }
 0x2a2   :  { %v359_v46 = vpop.f32.mrf.mxu1 }
 0x2a3   :  { %v369_v47 = vmax.f32 %v365_v45, 0.0  ;;  %v360_v48 = vadd.f32 %v359_v46, %v690_v18 }
 0x2a5   :  { %v368_v49 = vmax.f32 %v360_v48, 0.0  ;;  %v371_v50 = vsel %vm693_vm5, %v369_v47, 0.0 }
 0x2a6   :  { %382 = vrot.lane.b32.xlu1 %v371_v50, %s608_s22 }
 0x2a7   :  { %v370_v51 = vsel %vm693_vm5, %v368_v49, 0.0 }
 0x2a8   :  { %380 = vrot.lane.b32.xlu0 %v370_v51, %s608_s22 }
 0x2aa   :  { %376 = vrot.lane.b32.xlu1 %v371_v50, %s609_s25 }
 0x2ac   :  { %374 = vrot.lane.b32.xlu0 %v370_v51, %s609_s25 }
 0x2ae   :  { %40 = vperm.xlu1 %607, %v36_v52  }
 0x2b0   :  { %45 = vperm.xlu0 %606, %v37_v53  }
 0x318   :  { %v383_v54 = vpop.permute.xlu1 %382 }
 0x319   :  { %588 = vmatprep.subr.mxu0 %v383_v54 }
 0x31a   :  { %589 = vmatpush3.msra.mxu0 %v383_v54  ;;  %v381_v55 = vpop.permute.xlu0 %380 }
 0x31b   :  { %590 = vmatprep.subr.mxu0 %v381_v55 }
 0x31c   :  { %v377_v56 = vpop.permute.xlu1 %376  ;;  %591 = vmatpush3.msra.mxu0 %v381_v55 }
 0x31d   :  { %592 = vmatprep.subr.mxu0 %v377_v56 }
 0x31e   :  { %593 = vmatpush3.msra.mxu0 %v377_v56  ;;  %v375_v57 = vpop.permute.xlu0 %374 }
 0x31f   :  { %594 = vmatprep.subr.mxu0 %v375_v57 }
 0x320   :  { %595 = vmatpush3.msra.mxu0 %v375_v57 }
 0x321   :  { %596 = vmatprep.subr.msk.mxu0 %vm693_vm5, %v369_v47 }
 0x322   :  { %597 = vmatpush3.msk.msra.mxu0 %vm693_vm5, %v369_v47 }
 0x323   :  { %598 = vmatprep.subr.msk.mxu0 %vm693_vm5, %v368_v49 }
 0x324   :  { %599 = vmatpush3.msk.msra.mxu0 %vm693_vm5, %v368_v49 }
 0x325   :  { %601 = vmatmul.mubr.msk.f32.vlgmr.msra.gmra.mxu0 %vm177_vm6, %v737_v36 }
 0x329   :  { %v41_v58 = vpop.permute.xlu1 %40 }
 0x32a   :  { %v251_v59 = vadd.f32 %v250_v43, %v41_v58 }
 0x32b   :  { %v46_v60 = vpop.permute.xlu0 %45 }
 0x32c   :  { %v259_v61 = vmax.f32 %v251_v59, 0.0  ;;  %v256_v62 = vadd.f32 %v566_v42, %v46_v60 }
 0x32e   :  { %262 = vst.msk [vmem:[%s802_s5] sm:$0xff] %vm261_vm2, %v259_v61  ;;  %v260_v63 = vmax.f32 %v256_v62, 0.0 }
 0x330   :  { %263 = vst.msk [vmem:[%s802_s5 + $0x8] sm:$0xff] %vm261_vm2, %v260_v63 }
 0x3e5   :  { %v602_v0 = vpop.f32.mrf.mxu0 }
 0x3e6   :  { %v458_v1 = vadd.f32 %v602_v0, %v46_v60 }
 0x3e7   :  { %v452_v2 = vpop.f32.mrf.mxu0 }
 0x3e8   :  { %v462_v3 = vmax.f32 %v458_v1, 0.0  ;;  %v453_v4 = vadd.f32 %v452_v2, %v41_v58 }
 0x3ea   :  { %489 = vst.msk [vmem:[%s802_s5 + $0x30] sm:$0xff] %vm261_vm2, %v462_v3  ;;  %v461_v5 = vmax.f32 %v453_v4, 0.0 }
 0x3ec   :  { %488 = vst.msk [vmem:[%s802_s5 + $0x28] sm:$0xff] %vm261_vm2, %v461_v5 }

</bundles_post_ra>
